<compile_context>
chip_gen: v6e
topology: v6e:2x2x1
jax: 0.10.0
libtpu: 0.0.40
codegen_flags: <defaults>
</compile_context>

<pallas_src>
import jax
import jax.numpy as jnp
from jax.experimental import pallas as pl
from jax.experimental.pallas import tpu as pltpu


def _round_up(x, m):
    return ((x + m - 1) // m) * m


def _mlp_kernel(z_ref, w0_ref, b0_ref, w1_ref, b1_ref, w2_ref, b2_ref, o_ref):
    # Layer 0: Linear (bf16 operands, f32 accumulation) + bias + ReLU (f32).
    h = jnp.dot(z_ref[...], w0_ref[...], preferred_element_type=jnp.float32)
    h = jnp.maximum(h + b0_ref[...], 0.0)
    # Layer 1: Linear + ReLU.
    h = jnp.dot(h.astype(jnp.bfloat16), w1_ref[...], preferred_element_type=jnp.float32)
    h = jnp.maximum(h + b1_ref[...], 0.0)
    # Output layer: Linear (no activation); output width is lane-dense (padded to 128).
    out = jnp.dot(h.astype(jnp.bfloat16), w2_ref[...], preferred_element_type=jnp.float32)
    o_ref[...] = (out + b2_ref[...]).astype(o_ref.dtype)


def classifier_forward(z, params, *, tile_m=1024):
    """z: (B, N, 2*D) float32.  Returns (B, N, num_leads) float32."""
    B, N, D2 = z.shape
    M = B * N
    z2d = z.reshape(M, D2)

    w0, b0, w1, b1, w2, b2 = params
    H0 = w0.shape[1]
    H1 = w1.shape[1]
    C = w2.shape[1]

    # ---- choose row tile (multiple of 8; ragged M handled via zero-padding) ----
    tile_m = max(8, _round_up(tile_m, 8))
    m8 = _round_up(M, 8)
    tm = min(tile_m, m8)
    # Keep at least 2 grid steps when there is enough data (v7x has 2 TCs/chip;
    # costs nothing on v5e/v6e).
    if m8 > 8 and m8 <= tm:
        tm = max(8, _round_up((M + 1) // 2, 8))
    grid_m = -(-m8 // tm)          # ceil-div
    M_pad = grid_m * tm

    # ---- lane-dense output: pad num_leads up to a multiple of 128 ----
    C_pad = _round_up(C, 128)

    # ---- operand preparation: bf16 matmul inputs, f32 biases ----
    z_p = z2d
    if M_pad != M:
        z_p = jnp.pad(z_p, ((0, M_pad - M), (0, 0)))
    z_bf = z_p.astype(jnp.bfloat16)
    w0_bf = w0.astype(jnp.bfloat16)
    w1_bf = w1.astype(jnp.bfloat16)
    w2_bf = jnp.pad(w2, ((0, 0), (0, C_pad - C))).astype(jnp.bfloat16)
    b0_f = b0.reshape(1, H0).astype(jnp.float32)
    b1_f = b1.reshape(1, H1).astype(jnp.float32)
    b2_f = jnp.pad(b2.reshape(1, C), ((0, 0), (0, C_pad - C))).astype(jnp.float32)

    full = lambda i: (0, 0)
    cost = pl.CostEstimate(
        flops=2 * M_pad * (D2 * H0 + H0 * H1 + H1 * C_pad),
        transcendentals=0,
        bytes_accessed=M_pad * (D2 * 2 + C_pad * 4)
        + 2 * (D2 * H0 + H0 * H1 + H1 * C_pad),
    )

    out2d = pl.pallas_call(
        _mlp_kernel,
        out_shape=jax.ShapeDtypeStruct((M_pad, C_pad), jnp.float32),
        grid=(grid_m,),
        in_specs=[
            pl.BlockSpec((tm, D2), lambda i: (i, 0)),   # z rows (bf16, tiled)
            pl.BlockSpec((D2, H0), full),               # W0 (resident)
            pl.BlockSpec((1, H0), full),                # b0
            pl.BlockSpec((H0, H1), full),               # W1
            pl.BlockSpec((1, H1), full),                # b1
            pl.BlockSpec((H1, C_pad), full),            # W2 (lane-padded)
            pl.BlockSpec((1, C_pad), full),             # b2 (lane-padded)
        ],
        out_specs=pl.BlockSpec((tm, C_pad), lambda i: (i, 0)),
        compiler_params=pltpu.CompilerParams(
            dimension_semantics=("parallel",)),
        cost_estimate=cost,
    )(z_bf, w0_bf, b0_f, w1_bf, b1_f, w2_bf, b2_f)

    return out2d[:M, :C].reshape(B, N, C)


def init_params(key, d2, h0, h1, num_leads):
    """Deterministic synthetic parameters (stand-in for the nn.Linear weights)."""
    ks = jax.random.split(key, 6)
    scale = 0.1
    w0 = scale * jax.random.normal(ks[0], (d2, h0), jnp.float32)
    b0 = scale * jax.random.normal(ks[1], (1, h0), jnp.float32)
    w1 = scale * jax.random.normal(ks[2], (h0, h1), jnp.float32)
    b1 = scale * jax.random.normal(ks[3], (1, h1), jnp.float32)
    w2 = scale * jax.random.normal(ks[4], (h1, num_leads), jnp.float32)
    b2 = scale * jax.random.normal(ks[5], (1, num_leads), jnp.float32)
    return (w0, b0, w1, b1, w2, b2)


if __name__ == "__main__":
    # Small config consistent with the module:
    #   feature_dim D = 16  -> input 2*D = 32
    #   classifier.layers = [{out:64}, {in:64, out:64}, {in:64}]
    #   num_leads = 8
    B, N, D = 2, 8, 16
    D2 = 2 * D
    H0, H1 = 64, 64
    NUM_LEADS = 8

    key = jax.random.PRNGKey(0)
    k_z, k_p = jax.random.split(key)
    z = jax.random.normal(k_z, (B, N, D2), jnp.float32)
    params = init_params(k_p, D2, H0, H1, NUM_LEADS)

    out = classifier_forward(z, params)
    out = jax.block_until_ready(out)

    # Reference in plain JAX using the same bf16-operand / f32-accumulate math.
    w0, b0, w1, b1, w2, b2 = params
    x = z.reshape(B * N, D2).astype(jnp.bfloat16)
    h = jnp.dot(x, w0.astype(jnp.bfloat16), preferred_element_type=jnp.float32) + b0
    h = jnp.maximum(h, 0.0)
    h = jnp.dot(h.astype(jnp.bfloat16), w1.astype(jnp.bfloat16),
                preferred_element_type=jnp.float32) + b1
    h = jnp.maximum(h, 0.0)
    ref = jnp.dot(h.astype(jnp.bfloat16), w2.astype(jnp.bfloat16),
                  preferred_element_type=jnp.float32) + b2
    ref = ref.reshape(B, N, NUM_LEADS)

    assert out.shape == (B, N, NUM_LEADS), out.shape
    assert jnp.allclose(out, ref, atol=2e-3, rtol=2e-3), float(jnp.max(jnp.abs(out - ref)))
    print("KERNEL_OK")
</pallas_src>

<mosaic_0001>
module attributes {stable_mosaic.version = 11 : i64} {
  func.func @_mlp_kernel(%arg0: i32, %arg1: memref<8x32xbf16, #tpu.memory_space<vmem>>, %arg2: memref<32x64xbf16, #tpu.memory_space<vmem>>, %arg3: memref<1x64xf32, #tpu.memory_space<vmem>>, %arg4: memref<64x64xbf16, #tpu.memory_space<vmem>>, %arg5: memref<1x64xf32, #tpu.memory_space<vmem>>, %arg6: memref<64x128xbf16, #tpu.memory_space<vmem>>, %arg7: memref<1x128xf32, #tpu.memory_space<vmem>>, %arg8: memref<8x128xf32, #tpu.memory_space<vmem>>) attributes {dimension_semantics = [#tpu.dimension_semantics<parallel>], iteration_bounds = array<i64: 2>, scalar_prefetch = 0 : i64, scratch_operands = 0 : i64, tpu.core_type = #tpu.core_type<tc>, window_params = [{transform_indices = @transform_0, window_bounds = array<i64: 8, 32>}, {pipeline_mode = #tpu.pipeline_mode<synchronous>, transform_indices = @transform_1, window_bounds = array<i64: 32, 64>}, {pipeline_mode = #tpu.pipeline_mode<synchronous>, transform_indices = @transform_2, window_bounds = array<i64: 1, 64>}, {pipeline_mode = #tpu.pipeline_mode<synchronous>, transform_indices = @transform_3, window_bounds = array<i64: 64, 64>}, {pipeline_mode = #tpu.pipeline_mode<synchronous>, transform_indices = @transform_4, window_bounds = array<i64: 1, 64>}, {pipeline_mode = #tpu.pipeline_mode<synchronous>, transform_indices = @transform_5, window_bounds = array<i64: 64, 128>}, {pipeline_mode = #tpu.pipeline_mode<synchronous>, transform_indices = @transform_6, window_bounds = array<i64: 1, 128>}, {transform_indices = @transform_7, window_bounds = array<i64: 8, 128>}]} {
    %c0 = arith.constant 0 : index
    %c0_0 = arith.constant 0 : index
    %0 = vector.load %arg1[%c0, %c0_0] : memref<8x32xbf16, #tpu.memory_space<vmem>>, vector<8x32xbf16>
    %c0_1 = arith.constant 0 : index
    %c0_2 = arith.constant 0 : index
    %1 = vector.load %arg2[%c0_1, %c0_2] : memref<32x64xbf16, #tpu.memory_space<vmem>>, vector<32x64xbf16>
    %cst = arith.constant dense<0.000000e+00> : vector<8x64xf32>
    %2 = tpu.matmul %0, %1, %cst {dimension_numbers = #tpu.dot_dimension_numbers<[1], [0], [0], [1], [0, 0, 1, 1], [], []>} : vector<8x32xbf16>, vector<32x64xbf16>, vector<8x64xf32> -> vector<8x64xf32>
    %c0_3 = arith.constant 0 : index
    %c0_4 = arith.constant 0 : index
    %3 = vector.load %arg3[%c0_3, %c0_4] : memref<1x64xf32, #tpu.memory_space<vmem>>, vector<1x64xf32>
    %4 = vector.broadcast %3 : vector<1x64xf32> to vector<8x64xf32>
    %5 = arith.addf %2, %4 : vector<8x64xf32>
    %cst_5 = arith.constant 0.000000e+00 : f32
    %6 = vector.broadcast %cst_5 : f32 to vector<8x64xf32>
    %7 = arith.maximumf %5, %6 : vector<8x64xf32>
    %8 = arith.truncf %7 : vector<8x64xf32> to vector<8x64xbf16>
    %c0_6 = arith.constant 0 : index
    %c0_7 = arith.constant 0 : index
    %9 = vector.load %arg4[%c0_6, %c0_7] : memref<64x64xbf16, #tpu.memory_space<vmem>>, vector<64x64xbf16>
    %cst_8 = arith.constant dense<0.000000e+00> : vector<8x64xf32>
    %10 = tpu.matmul %8, %9, %cst_8 {dimension_numbers = #tpu.dot_dimension_numbers<[1], [0], [0], [1], [0, 0, 1, 1], [], []>} : vector<8x64xbf16>, vector<64x64xbf16>, vector<8x64xf32> -> vector<8x64xf32>
    %c0_9 = arith.constant 0 : index
    %c0_10 = arith.constant 0 : index
    %11 = vector.load %arg5[%c0_9, %c0_10] : memref<1x64xf32, #tpu.memory_space<vmem>>, vector<1x64xf32>
    %12 = vector.broadcast %11 : vector<1x64xf32> to vector<8x64xf32>
    %13 = arith.addf %10, %12 : vector<8x64xf32>
    %cst_11 = arith.constant 0.000000e+00 : f32
    %14 = vector.broadcast %cst_11 : f32 to vector<8x64xf32>
    %15 = arith.maximumf %13, %14 : vector<8x64xf32>
    %16 = arith.truncf %15 : vector<8x64xf32> to vector<8x64xbf16>
    %c0_12 = arith.constant 0 : index
    %c0_13 = arith.constant 0 : index
    %17 = vector.load %arg6[%c0_12, %c0_13] : memref<64x128xbf16, #tpu.memory_space<vmem>>, vector<64x128xbf16>
    %cst_14 = arith.constant dense<0.000000e+00> : vector<8x128xf32>
    %18 = tpu.matmul %16, %17, %cst_14 {dimension_numbers = #tpu.dot_dimension_numbers<[1], [0], [0], [1], [0, 0, 1, 1], [], []>} : vector<8x64xbf16>, vector<64x128xbf16>, vector<8x128xf32> -> vector<8x128xf32>
    %c0_15 = arith.constant 0 : index
    %c0_16 = arith.constant 0 : index
    %19 = vector.load %arg7[%c0_15, %c0_16] : memref<1x128xf32, #tpu.memory_space<vmem>>, vector<1x128xf32>
    %20 = vector.broadcast %19 : vector<1x128xf32> to vector<8x128xf32>
    %21 = arith.addf %18, %20 : vector<8x128xf32>
    %c0_17 = arith.constant 0 : index
    %c0_18 = arith.constant 0 : index
    %22 = vector.load %arg8[%c0_17, %c0_18] : memref<8x128xf32, #tpu.memory_space<vmem>>, vector<8x128xf32>
    tpu.vector_store %arg8[%c0_17, %c0_18], %21 {strides = array<i32>} : memref<8x128xf32, #tpu.memory_space<vmem>>, vector<8x128xf32>,
    return
  }
  func.func @transform_0(%arg0: i32) -> (i32, i32) {
    %c0_i32 = arith.constant 0 : i32
    %c0_i32_0 = arith.constant 0 : i32
    return %arg0, %c0_i32 : i32, i32
  }
  func.func @transform_1(%arg0: i32) -> (i32, i32) {
    %c0_i32 = arith.constant 0 : i32
    %c0_i32_0 = arith.constant 0 : i32
    %c0_i32_1 = arith.constant 0 : i32
    return %c0_i32, %c0_i32_0 : i32, i32
  }
  func.func @transform_2(%arg0: i32) -> (i32, i32) {
    %c0_i32 = arith.constant 0 : i32
    %c0_i32_0 = arith.constant 0 : i32
    %c0_i32_1 = arith.constant 0 : i32
    return %c0_i32, %c0_i32_0 : i32, i32
  }
  func.func @transform_3(%arg0: i32) -> (i32, i32) {
    %c0_i32 = arith.constant 0 : i32
    %c0_i32_0 = arith.constant 0 : i32
    %c0_i32_1 = arith.constant 0 : i32
    return %c0_i32, %c0_i32_0 : i32, i32
  }
  func.func @transform_4(%arg0: i32) -> (i32, i32) {
    %c0_i32 = arith.constant 0 : i32
    %c0_i32_0 = arith.constant 0 : i32
    %c0_i32_1 = arith.constant 0 : i32
    return %c0_i32, %c0_i32_0 : i32, i32
  }
  func.func @transform_5(%arg0: i32) -> (i32, i32) {
    %c0_i32 = arith.constant 0 : i32
    %c0_i32_0 = arith.constant 0 : i32
    %c0_i32_1 = arith.constant 0 : i32
    return %c0_i32, %c0_i32_0 : i32, i32
  }
  func.func @transform_6(%arg0: i32) -> (i32, i32) {
    %c0_i32 = arith.constant 0 : i32
    %c0_i32_0 = arith.constant 0 : i32
    %c0_i32_1 = arith.constant 0 : i32
    return %c0_i32, %c0_i32_0 : i32, i32
  }
  func.func @transform_7(%arg0: i32) -> (i32, i32) {
    %c0_i32 = arith.constant 0 : i32
    %c0_i32_0 = arith.constant 0 : i32
    return %arg0, %c0_i32 : i32, i32
  }
}

</mosaic_0001>

<bundles_post_ra>
// kernel: tpu_custom_call.1
= control target key start
LH: loop header
LB: loop body
LE: loop exit
PB: predicated region body
PF: predicated region fallthrough
CT: control target
= control target key end

     0   :  { %s1293_s0 = inlined_call_operand.hbm [shape: bf16[16,32], index: 0, kind: input, shape index: {}]   ;;  %s1294_s1 = inlined_call_operand.hbm [shape: bf16[32,64], index: 1, kind: input, shape index: {}]   ;;  %s1295_s2 = inlined_call_operand.vmem [shape: f32[1,64], index: 2, kind: input, shape index: {}]   ;;  %s1296_s3 = inlined_call_operand.hbm [shape: bf16[64,64], index: 3, kind: input, shape index: {}]   ;;  %s1297_s4 = inlined_call_operand.vmem [shape: f32[1,64], index: 4, kind: input, shape index: {}]   ;;  %s1298_s5 = inlined_call_operand.hbm [shape: bf16[64,128], index: 5, kind: input, shape index: {}]   ;;  %s1299_s6 = inlined_call_operand.vmem [shape: f32[1,128], index: 6, kind: input, shape index: {}]   ;;  %s1300_s7 = inlined_call_operand.hbm [shape: f32[16,128], index: 7, kind: output, shape index: {}]  }
   0x1   :  { %1305 = sst [smem:[#allocation15_spill]] %s1294_s1 }
   0x2   :  { %1306 = sst [smem:[#allocation16_spill]] %s1296_s3 }
   0x3   :  { %12 = vsyncpa [#allocation3], 0 }
   0x4   :  { %14 = vsyncpa [#allocation3 + $0x1], 0 }
   0x5   :  { %15 = vsyncpa [#allocation6], 0 }
   0x6   :  { %16 = vsyncpa [#allocation9], 0 }
   0x7   :  { %17 = vsyncpa [#allocation4], 0 }
   0x8   :  { %19 = vsyncpa [#allocation4 + $0x1], 0  ;;  %s1089_s24 = smov 0   ;;  %s1091_s25 = smov 0  }
   0x9   :  { %s1093_s26 = smov 0   ;;  %s1095_s27 = smov 0  }
   0xa LB: > { %s1110_s28 = sadd.s32 4294967295, %s1038_s27   ;;  %s690_s29 = sadd.s32 4294967294, %s1038_s27   ;;  %s1038_s27 = sphi %s1095_s27, %s1328_s27   ;;  %s1034_s26 = sphi %s1093_s26, %s1327_s26   ;;  %s1030_s25 = sphi %s1091_s25, %s1326_s25   ;;  %s1026_s24 = sphi %s1089_s24, %s1325_s24  }
   0xb   : > { %p45_p0 = scmp.ne.s32.totalorder %s1030_s25, %s1026_s24  ;;  %p1301_p1 = scmp.eq.s32.totalorder %s1110_s28, 0 }
   0xc   : > { %p201_p3 = scmp.eq.s32.totalorder %s690_s29, 1  ;;  %p691_p5 = scmp.ge.s32.totalorder %s1038_s27, 1 }
   0xd   : > { %p1119_p4 = por %p1301_p1, %p45_p0  ;;  %p208_p7 = scmp.lt.s32.totalorder %s1038_s27, 3 }
   0xe   : > { %p1124_p6 = por %p201_p3, %p45_p0  ;;  %s1040_s10 = smov [#allocation5]  }
   0xf   : > { %s1307_s30 = scalar_select %p1119_p4, 1, 0 }
  0x10   : > { %s1308_s8 = scalar_select %p1124_p6, 1, 0 }
  0x11   : > { %p1129_p8 = pnand %p691_p5, %p208_p7  ;;  %s220_s11 = sshll.u32 %s1040_s10, 4  ;;  %s221_s11 = int_to_ptr.vmem [resolvable:$true] %s220_s11 }
  0x12   : > { %s1041_s13 = smov [#allocation7]   ;;  %s1042_s15 = smov [#allocation8]  }
  0x13   : > { %s1309_s9 = scalar_select %p1129_p8, 1, 0 }
  0x14   : > { %p785_p9 = pneg %p1129_p8  ;;  %s236_s14 = sshll.u32 %s1041_s13, 4  ;;  %s237_s14 = int_to_ptr.vmem [resolvable:$true] %s236_s14 }
  0x15   : > { %s252_s16 = sshll.u32 %s1042_s15, 4  ;;  %s871_s17 = scalar_lea.vmem %s221_s11, 256  ;;  %s253_s16 = int_to_ptr.vmem [resolvable:$true] %s252_s16 }
  0x16   : > { %p1138_p11 = pnand %p785_p9, %p1301_p1  ;;  %p872_p13 = scmp.ne.s32.totalorder %s221_s11, %s871_s17 }
  0x17   : > { %p879_p5 = scmp.lt.s32.totalorder %s221_s11, %s221_s11  ;;  %p880_p7 = scmp.lt.s32.totalorder %s871_s17, %s871_s17 }
  0x18   : > { %p862_p12 = pneg %p1138_p11 }
  0x19   : > { %p881_p9 = por %p880_p7, %p879_p5 }
  0x1a   : > { %p874_p0 = pnand %p872_p13, %p862_p12 }
  0x1c   : > { %p875_p3 = pneg %p874_p0 }
  0x1e   : > { %p882_p10 = pnand %p881_p9, %p875_p3 }
  0x20   : > { %885 = shalt.err (!%p882_p10)
}
  0x21   : > { %s1043_s18 = smov 64   ;;  %s1044_s19 = smov 4  }
  0x22   : > { %s1311_s1 = sld [smem:[#allocation15_spill]]  ;;  %s897_s22 = scalar_lea.vmem %s237_s14, 512 }
  0x23   : > { %p898_p1 = scmp.ne.s32.totalorder %s237_s14, %s897_s22  ;;  %p905_p2 = scmp.lt.s32.totalorder %s237_s14, %s237_s14 }
  0x24   : > { %p906_p6 = scmp.lt.s32.totalorder %s897_s22, %s897_s22 }
  0x25   : > { %p900_p13 = pnand %p898_p1, %p862_p12 }
  0x26   : > { %p907_p5 = por %p906_p6, %p905_p2 }
  0x27   : > { %p901_p0 = pneg %p900_p13 }
  0x28   : > { %788 = dma.hbm_to_vmem [thread:$0]  (!%p1138_p11), %s1311_s1, 256, %s221_s11, [#allocation6], %s1043_s18, %s1043_s18, %s1044_s19  }
  0x29   : > { %p908_p3 = pnand %p907_p5, %p901_p0 }
  0x2b   : > { %911 = shalt.err (!%p908_p3)
}
  0x2c   : > { %s1312_s3 = sld [smem:[#allocation16_spill]]  ;;  %s923_s10 = scalar_lea.vmem %s253_s16, 512 }
  0x2d   : > { %p924_p10 = scmp.ne.s32.totalorder %s253_s16, %s923_s10  ;;  %p931_p9 = scmp.lt.s32.totalorder %s253_s16, %s253_s16 }
  0x2e   : > { %p932_p13 = scmp.lt.s32.totalorder %s923_s10, %s923_s10 }
  0x2f   : > { %p926_p7 = pnand %p924_p10, %p862_p12 }
  0x30   : > { %p933_p4 = por %p932_p13, %p931_p9 }
  0x31   : > { %p927_p1 = pneg %p926_p7 }
  0x32   : > { %791 = dma.hbm_to_vmem [thread:$0]  (!%p1138_p11), %s1312_s3, 512, %s237_s14, [#allocation6], %s1043_s18, %s1043_s18, %s1044_s19  }
  0x33   : > { %p934_p2 = pnand %p933_p4, %p927_p1 }
  0x35   : > { %937 = shalt.err (!%p934_p2)
}
  0x36   : > { %794 = dma.hbm_to_vmem [thread:$0]  (!%p1138_p11), %s1298_s5, 512, %s253_s16, [#allocation9], %s1043_s18, %s1043_s18, %s1044_s19  }
  0x37   : > { %s1169_s14 = sadd.s32 1, %s1038_s27   ;;  %s32_s12 = sadd.s32 1, %s1034_s26 }
  0x38   : > { %s29_s15 = ssub.s32 %s1038_s27, %s1169_s14  ;;  %p39_p6 = scmp.ne.s32.totalorder %s1034_s26, %s1030_s25 }
  0x39   : > { %p30_p4 = scmp.eq.s32.totalorder %s29_s15, 0  ;;  %p40_p12 = scmp.eq.s32.totalorder %s1038_s27, 0 }
  0x3a   : > { %p806_p0 = scmp.lt.s32.totalorder %s1038_s27, 2  ;;  %p1313_p3 = scmp.eq.s32.totalorder %s1110_s28, 1 }
  0x3b   : > { %s1179_s17 = scalar_select %p30_p4, %s1034_s26, %s32_s12  }
  0x3c   : > { %p41_p5 = por %p40_p12, %p39_p6  ;;  %p1183_p10 = por %p1313_p3, %p39_p6 }
  0x3d   : > { %s269_s21 = sand.u32 1, %s1034_s26   ;;  %s697_s22 = sshll.u32 %s1038_s27, 6 }
  0x3e   : > { %s1314_s20 = scalar_select %p1183_p10, 1, 0 }
  0x3f   : > { %s696_s16 = sshll.u32 %s269_s21, 2  ;;  %s1192_s23 = scalar_lea.hbm %s1293_s0, %s697_s22 }
  0x40   : > { %s273_s29 = scalar_lea.vmem [#allocation2], %s696_s16  ;;  %p1194_p11 = pnand %p806_p0, %p41_p5 }
  0x41   : > { %s280_s10 = sshll.u32 %s273_s29, 4  ;;  %s270_s13 = scalar_lea.sflag [#allocation3], %s269_s21  ;;  %s281_s10 = int_to_ptr.vmem [resolvable:$true] %s280_s10 }
  0x42   : > { %s938_s15 = scalar_lea.hbm %s1192_s23, 64  ;;  %p940_p1 = pneg %p1194_p11 }
  0x43   : > { %p939_p7 = scmp.ne.s32.totalorder %s1192_s23, %s938_s15  ;;  %s943_s18 = scalar_lea.hbm %s1293_s0, 128 }
  0x44   : > { %p944_p2 = scmp.lt.s32.totalorder %s1192_s23, %s1293_s0  ;;  %p945_p4 = scmp.lt.s32.totalorder %s943_s18, %s938_s15 }
  0x45   : > { %p941_p9 = pnand %p940_p1, %p939_p7 }
  0x46   : > { %p946_p6 = por %p945_p4, %p944_p2 }
  0x47   : > { %p942_p13 = pneg %p941_p9 }
  0x49   : > { %p947_p12 = pnand %p946_p6, %p942_p13 }
  0x4b   : > { %950 = shalt.err (!%p947_p12)
}
  0x4c   : > { %s951_s29 = scalar_lea.vmem %s281_s10, 64  ;;  %s1045_s21 = smov [#allocation2]  }
  0x4d   : > { %p952_p0 = scmp.ne.s32.totalorder %s281_s10, %s951_s29  ;;  %s956_s1 = sshll.u32 %s1045_s21, 4  ;;  %s957_s1 = int_to_ptr.vmem [resolvable:$false] %s956_s1 }
  0x4e   : > { %s958_s3 = scalar_lea.vmem %s957_s1, 128  ;;  %p959_p7 = scmp.lt.s32.totalorder %s281_s10, %s957_s1 }
  0x4f   : > { %p954_p5 = pnand %p952_p0, %p940_p1  ;;  %p960_p9 = scmp.lt.s32.totalorder %s958_s3, %s951_s29 }
  0x51   : > { %p955_p3 = pneg %p954_p5  ;;  %p961_p10 = por %p960_p9, %p959_p7 }
  0x53   : > { %p962_p8 = pnand %p961_p10, %p955_p3 }
  0x55   : > { %965 = shalt.err (!%p962_p8)
}
  0x56   : > { %798 = dma.hbm_to_vmem [thread:$0]  (!%p1194_p11), %s1192_s23, 64, %s281_s10, %s270_s13  }
  0x57   : > { %p1316_p13 = scmp.ne.s32.totalorder %s1309_s9, 0 }
  0x58   : > { %s1215_s15 = sand.u32 (!%p1316_p13), 1, %s1030_s25   ;;  %p1317_p1 = scmp.ne.s32.totalorder (!%p1316_p13), %s1307_s30, 0 }
  0x59   : > { %289 = sbr.rel (%p1316_p13) target bundleno = 718 (0x2ce), region = 48  ;;  %s699_s12 = sshll.u32 (!%p1316_p13), %s1215_s15, 2 }
  0x5a   : > { %s292_s22 = scalar_lea.sflag (!%p1316_p13), [#allocation3], %s1215_s15  ;;  %s295_s1 = scalar_lea.vmem (!%p1316_p13), [#allocation2], %s699_s12 }
  0x5e   : > { %1009 = dma.done.wait (%p1317_p1), %s292_s22, 64  }
  0x5f   : > { %1011 = vsyncadd (%p1317_p1), %s292_s22, 4294967232  ;;  %p1318_p8 = scmp.eq.s32.totalorder %s1110_s28, 0 }
  0x61   : > { %1013 = dma.done.wait (%p1318_p8), [#allocation6], 768   ;;  %p1319_p10 = pmov %p1318_p8 }
  0x62   : > { %p1320_p11 = pmov %p1318_p8 }
  0x63   : > { %1015 = vsyncadd (%p1319_p10), [#allocation6], 4294966528 }
  0x64   : > { %1017 = dma.done.wait (%p1320_p11), [#allocation9], 512   ;;  %p1321_p2 = pmov %p1318_p8 }
  0x65   : > { %v1046_v0 = vmov 0.0   ;;  %vm1047_vm0 = vmmov 0   ;;  %v850_v1 = vld [vmem:[#allocation5 + $0x8] sm:$0xff]   ;;  %v851_v2 = vld [vmem:[#allocation5] sm:$0xff]   ;;  %v339_v4 = vld [vmem:[%s295_s1] sm:$0xf] }
  0x66   : > { %1019 = vsyncadd (%p1321_p2), [#allocation9], 4294966784  ;;  %737 = vmatprep.subr.bf16.mxu0 %v1046_v0  ;;  %741 = vmatprep.mubr.msk.bf16.mxu0 %vm1047_vm0, %v1046_v0  ;;  %v852_v3 = vld [vmem:[#allocation7 + $0x18] sm:$0xff]   ;;  %vm363_vm1 = vcmask 261120   ;;  %v853_v5 = vld [vmem:[#allocation7 + $0x10] sm:$0xff]   ;;  %vm448_vm2 = vcmask 523264  }
  0x67   : > { %745 = vmatprep.subr.bf16.mxu1 %v1046_v0  ;;  %753 = vmatprep.mubr.msk.bf16.mxu1 %vm1047_vm0, %v1046_v0  ;;  %v854_v6 = vld [vmem:[#allocation7 + $0x8] sm:$0xff]   ;;  %v855_v7 = vld [vmem:[#allocation7] sm:$0xff]   ;;  %v856_v8 = vld [vmem:[#allocation8 + $0x18] sm:$0xff]   ;;  %s703_s10 = sshll.u32 %s1215_s15, 3  ;;  %s721_s18 = sshll.u32 %s1110_s28, 7 }
  0x68   : > { %738 = vmatpush3.bf16.msra.mxu0 %v850_v1  ;;  %746 = vmatpush3.bf16.msra.mxu1 %v852_v3  ;;  %v857_v9 = vld [vmem:[#allocation8 + $0x10] sm:$0xff]   ;;  %v704_v10 = vld [vmem:[%s1295_s2] ss:$0 sm:$0xff]  ;;  %v859_v19 = vld [vmem:[#allocation8] sm:$0xff]   ;;  %s337_s19 = scalar_lea.vmem [#allocation10], %s703_s10  ;;  %s1250_s12 = scalar_lea.hbm %s1300_s7, %s721_s18 }
  0x69   : > { %739 = vmatprep.subr.bf16.mxu0 %v1046_v0  ;;  %747 = vmatprep.subr.bf16.mxu1 %v1046_v0  ;;  %v858_v18 = vld [vmem:[#allocation8 + $0x8] sm:$0xff]   ;;  %s591_s16 = sshll.u32 %s337_s19, 4  ;;  %s578_s22 = scalar_lea.sflag [#allocation4], %s1215_s15  ;;  %s1252_s16 = int_to_ptr.vmem [resolvable:$true] %s591_s16 }
  0x6a   : > { %v708_v20 = vld [vmem:[%s1297_s4] ss:$0 sm:$0xff]  ;;  %s966_s1 = scalar_lea.vmem %s1252_s16, 128  ;;  %p1322_p6 = scmp.ne.s32.totalorder %s1314_s20, 0 }
  0x6b   : > { %v714_v28 = vld [vmem:[%s1299_s6] ss:$0 sm:$0xff]  ;;  %p967_p4 = scmp.ne.s32.totalorder %s1252_s16, %s966_s1  ;;  %s1048_s28 = smov [#allocation10]  }
  0x6c   : > { %740 = vmatpush3.bf16.msra.mxu0 %v851_v2  ;;  %748 = vmatpush3.bf16.msra.mxu1 %v853_v5  ;;  %s970_s3 = sshll.u32 %s1048_s28, 4  ;;  %s971_s3 = int_to_ptr.vmem [resolvable:$false] %s970_s3 }
  0x6d   : > { %757 = vmatprep.subr.bf16.mxu0 %v1046_v0  ;;  %749 = vmatprep.subr.bf16.mxu1 %v1046_v0  ;;  %p968_p12 = pnand %p967_p4, %p1322_p6  ;;  %s972_s30 = scalar_lea.vmem %s971_s3, 256 }
  0x6e   : > { %p973_p5 = scmp.lt.s32.totalorder %s1252_s16, %s971_s3  ;;  %p974_p3 = scmp.lt.s32.totalorder %s972_s30, %s966_s1 }
  0x6f   : > { %742 = vmatmul.mubr.msk.bf16.vlgmr.msra.gmra.mxu0 %vm363_vm1, %v339_v4  ;;  %p969_p0 = pneg %p968_p12 }
  0x70   : > { %765 = vmatprep.mubr.msk.bf16.mxu0 %vm1047_vm0, %v1046_v0  ;;  %750 = vmatpush3.bf16.msra.mxu1 %v854_v6  ;;  %p975_p7 = por %p974_p3, %p973_p5 }
  0x71   : > { %751 = vmatprep.subr.bf16.mxu1 %v1046_v0  ;;  %758 = vmatpush3.bf16.msra.mxu0 %v856_v8 }
  0x72   : > { %759 = vmatprep.subr.bf16.mxu0 %v1046_v0  ;;  %p976_p9 = pnand %p975_p7, %p969_p0 }
  0x74   : > { %752 = vmatpush3.bf16.msra.mxu1 %v855_v7 }
  0x75   : > { %760 = vmatpush3.bf16.msra.mxu0 %v857_v9 }
  0x76   : > { %761 = vmatprep.subr.bf16.mxu0 %v1046_v0 }
  0x79   : > { %762 = vmatpush3.bf16.msra.mxu0 %v858_v18 }
  0x7a   : > { %763 = vmatprep.subr.bf16.mxu0 %v1046_v0 }
  0x7d   : > { %764 = vmatpush3.bf16.msra.mxu0 %v859_v19 }
 0x12f   : > { %v401_v11 = vpop.f32.mrf.mxu0 }
 0x130   : > { %v402_v12 = vadd.f32 %v704_v10, %v401_v11 }
 0x131   : > { %v743_v13 = vpop.f32.mrf.mxu0 }
 0x132   : > { %v407_v14 = vmax.f32 %v402_v12, 0.0 }
 0x133   : > { %v404_v15 = vpop.f32.mrf.mxu0 }
 0x134   : > { %v408_v16 = vpack.c.bf16 %v407_v14, %v407_v14 }
 0x135   : > { %v744_v17 = vpop.f32.mrf.mxu0 }
 0x136   : > { %754 = vmatmul.mubr.msk.bf16.vlgmr.msra.gmra.mxu1 %vm448_vm2, %v408_v16 }
 0x1f6   : > { %v486_v21 = vpop.f32.mrf.mxu1 }
 0x1f7   : > { %v487_v22 = vadd.f32 %v708_v20, %v486_v21 }
 0x1f8   : > { %v755_v23 = vpop.f32.mrf.mxu1 }
 0x1f9   : > { %v492_v24 = vmax.f32 %v487_v22, 0.0 }
 0x1fa   : > { %v489_v25 = vpop.f32.mrf.mxu1 }
 0x1fb   : > { %v493_v26 = vpack.c.bf16 %v492_v24, %v492_v24 }
 0x1fc   : > { %v756_v27 = vpop.f32.mrf.mxu1 }
 0x1fd   : > { %766 = vmatmul.mubr.msk.bf16.vlgmr.msra.gmra.mxu0 %vm448_vm2, %v493_v26 }
 0x2bd   : > { %v570_v29 = vpop.f32.mrf.mxu0 }
 0x2be   : > { %v571_v30 = vadd.f32 %v714_v28, %v570_v29 }
 0x2bf   : > { %v767_v31 = vpop.f32.mrf.mxu0 }
 0x2c0   : > { %576 = vst [vmem:[%s337_s19] sm:$0xff] %v571_v30 }
 0x2c1   : > { %v573_v32 = vpop.f32.mrf.mxu0 }
 0x2c2   : > { %979 = shalt.err (!%p976_p9)
}
 0x2c3   : > { %s980_s9 = scalar_lea.hbm %s1250_s12, 128  ;;  %s984_s10 = scalar_lea.hbm %s1300_s7, 256 }
 0x2c4   : > { %p981_p13 = scmp.ne.s32.totalorder %s1250_s12, %s980_s9  ;;  %p985_p10 = scmp.lt.s32.totalorder %s1250_s12, %s1300_s7 }
 0x2c5   : > { %p986_p11 = scmp.lt.s32.totalorder %s984_s10, %s980_s9 }
 0x2c6   : > { %p982_p1 = pnand %p981_p13, %p1322_p6 }
 0x2c7   : > { %p987_p2 = por %p986_p11, %p985_p10 }
 0x2c8   : > { %p983_p8 = pneg %p982_p1 }
 0x2ca   : > { %p988_p4 = pnand %p987_p2, %p983_p8 }
 0x2cc   : > { %991 = shalt.err (!%p988_p4)
}
 0x2cd   : > { %783 = dma.vmem_to_hbm [thread:$0]  (%p1322_p6), %s1252_s16, 128, %s1250_s12, %s578_s22   ;;  %v768_v33 = vpop.f32.mrf.mxu0 }
 0x2ce PF: > { %s603_s18 = sand.u32 1, %s1026_s24   ;;  %p1323_p12 = scmp.ne.s32.totalorder %s1308_s8, 0 }
 0x2cf   : > { %p1324_p0 = scmp.ge.s32.totalorder %s1038_s27, 2  ;;  %s604_s19 = scalar_lea.sflag [#allocation4], %s603_s18 }
 0x2d1   : > { %p800_p5 = pnand %p1324_p0, %p1323_p12 }
 0x2d3   : > { %p801_p3 = pneg %p800_p5 }
 0x2d5   : > { %1021 = dma.done.wait (%p801_p3), %s604_s19, 128  }
 0x2d6   : > { %1023 = vsyncadd (%p801_p3), %s604_s19, 4294967168  ;;  %p22_p7 = scmp.ge.s32.totalorder %s1169_s14, 4   ;;  %s1325_s24 = smov %s1030_s25 }
 0x2d7   : > { %s1326_s25 = smov %s1034_s26  ;;  %s1327_s26 = smov %s1179_s17 }
 0x2d8   : > { %s1328_s27 = smov %s1169_s14  ;;  %24 = sbr.rel (!%p22_p7) target bundleno = 10 (0xa), region = 105 }
 0x2dd   :  { %609 = vsyncpa [#allocation3], 1 }
 0x2de   :  { %611 = vsyncpa [#allocation3 + $0x1], 1 }
 0x2df   :  { %612 = vsyncpa [#allocation6], 1 }
 0x2e0   :  { %613 = vsyncpa [#allocation9], 1 }
 0x2e1   :  { %614 = vsyncpa [#allocation4], 1 }
 0x2e2   :  { %616 = vsyncpa [#allocation4 + $0x1], 1 }

</bundles_post_ra>
